<compile_context>
chip_gen: v6e
topology: v6e:2x2x1
jax: 0.10.0
libtpu: 0.0.40
codegen_flags: <defaults>
</compile_context>

<pallas_src>
import functools
import math

import jax
import jax.numpy as jnp
from jax.experimental import pallas as pl
from jax.experimental.pallas import tpu as pltpu

_NEG_INF = -1e30  # finite "minus infinity" to avoid inf-inf NaN corner cases
_SUBLANE = 16     # bf16 sublane tile


def _round_up(x: int, m: int) -> int:
    return ((x + m - 1) // m) * m


def _cdiv(a: int, b: int) -> int:
    return (a + b - 1) // b


def _flash_sdpa_kernel(q_ref, k_ref, v_ref, o_ref,
                       qs_sc, m_sc, l_sc, acc_sc, *,
                       scale: float, seq_len: int, block_k: int,
                       needs_mask: bool, sum_col):
    kv = pl.program_id(1)

    @pl.when(kv == 0)
    def _init():
        # Hoisted Q scaling: scale = log2(e)/sqrt(d_k) folded in once per q
        # tile (scale in f32, then rounded to bf16 for the MXU).
        qs_sc[...] = (q_ref[...].astype(jnp.float32) * scale).astype(qs_sc.dtype)
        m_sc[...] = jnp.full_like(m_sc, _NEG_INF)
        acc_sc[...] = jnp.zeros_like(acc_sc)
        if sum_col is None:
            l_sc[...] = jnp.zeros_like(l_sc)

    # scores = (scale * q) @ k^T, bf16 operands, f32 accumulation, no explicit
    # transpose (contract the last axes directly).
    s = jax.lax.dot_general(
        qs_sc[...], k_ref[...], (((1,), (1,)), ((), ())),
        preferred_element_type=jnp.float32)

    if needs_mask:
        # (1, block_k) iota row, broadcast in the select — padded KV rows only.
        col = kv * block_k + jax.lax.broadcasted_iota(jnp.int32, (1, block_k), 1)
        s = jnp.where(col < seq_len, s, _NEG_INF)

    # Online softmax in the log2 domain (statistics and accumulator in f32).
    m_prev = m_sc[...]
    m_new = jnp.maximum(m_prev, jnp.max(s, axis=-1, keepdims=True))
    alpha = jnp.exp2(m_prev - m_new)
    p = jnp.exp2(s - m_new)
    p_b = p.astype(jnp.bfloat16)          # bf16 weights → full-rate PV matmul
    if sum_col is None:
        l_sc[...] = alpha * l_sc[...] + jnp.sum(p, axis=-1, keepdims=True)
    acc_sc[...] = alpha * acc_sc[...] + jnp.dot(
        p_b, v_ref[...], preferred_element_type=jnp.float32)
    m_sc[...] = m_new

    @pl.when(kv == pl.num_programs(1) - 1)
    def _finalize():
        acc = acc_sc[...]
        if sum_col is None:
            l = l_sc[...]
        else:
            # V's ones-column carried sum(p) through the PV matmul.
            l = acc[:, sum_col:sum_col + 1]
        o_ref[...] = (acc * (jnp.float32(1.0) / l)).astype(o_ref.dtype)


def scaled_dot_product_attention(q: jax.Array, k: jax.Array, v: jax.Array,
                                 *, block_q: int | None = None,
                                 block_k: int | None = None) -> jax.Array:
    """q, k, v: (seq_len, d_k). Returns (seq_len, d_k) in q.dtype."""
    assert q.shape == k.shape == v.shape and q.ndim == 2
    seq_len, d_k = q.shape
    out_dtype = q.dtype

    # Lane-dense feature axis: pad d_k up to a multiple of 128.
    # TODO(synk): for production multi-head use with small d_k, add a head
    # grid axis instead of padding the feature axis to 128.
    d_pad = _round_up(d_k, 128)

    # Tile defaults: block_q modest (bounds f32 score/softmax temporaries and
    # keeps num_q >= 2 so v7x megacore has work on both cores); block_k large
    # (cuts per-step pipeline overhead and online-softmax rescale work).
    if block_q is None:
        block_q = min(256, _round_up(_cdiv(seq_len, 2), _SUBLANE))
    if block_k is None:
        block_k = min(1024, _round_up(seq_len, _SUBLANE))
    block_q = max(_SUBLANE, _round_up(block_q, _SUBLANE))
    block_k = max(_SUBLANE, _round_up(block_k, _SUBLANE))

    s_pad_q = _round_up(seq_len, block_q)
    s_pad_k = _round_up(seq_len, block_k)
    num_q = s_pad_q // block_q
    num_kv = s_pad_k // block_k

    # Zero-pad, then cast to bf16 for the MXU (accumulation stays f32 inside).
    q_p = jnp.pad(q, ((0, s_pad_q - seq_len), (0, d_pad - d_k))).astype(jnp.bfloat16)
    k_p = jnp.pad(k, ((0, s_pad_k - seq_len), (0, d_pad - d_k))).astype(jnp.bfloat16)
    v_p = jnp.pad(v, ((0, s_pad_k - seq_len), (0, d_pad - d_k))).astype(jnp.bfloat16)

    # Ones-column trick: if there is a padded feature column, use the last one
    # to carry sum(p) through the PV matmul (removes the XLU row-reduction).
    sum_col = d_pad - 1 if d_pad > d_k else None
    if sum_col is not None:
        v_p = v_p.at[:, sum_col].set(jnp.bfloat16(1.0))

    kernel = functools.partial(
        _flash_sdpa_kernel,
        scale=math.log2(math.e) / math.sqrt(d_k),
        seq_len=seq_len,
        block_k=block_k,
        needs_mask=(s_pad_k != seq_len),
        sum_col=sum_col,
    )

    in_bytes = 2  # bf16
    cost = pl.CostEstimate(
        flops=4 * s_pad_q * s_pad_k * d_pad,
        transcendentals=2 * s_pad_q * s_pad_k,
        bytes_accessed=(s_pad_q * d_pad * in_bytes                       # Q
                        + num_q * 2 * s_pad_k * d_pad * in_bytes         # K,V re-streamed per q tile
                        + s_pad_q * d_pad * jnp.dtype(out_dtype).itemsize),
    )

    out_p = pl.pallas_call(
        kernel,
        out_shape=jax.ShapeDtypeStruct((s_pad_q, d_pad), out_dtype),
        grid_spec=pltpu.PrefetchScalarGridSpec(
            num_scalar_prefetch=0,
            grid=(num_q, num_kv),
            in_specs=[
                pl.BlockSpec((block_q, d_pad), lambda qi, ki: (qi, 0)),
                pl.BlockSpec((block_k, d_pad), lambda qi, ki: (ki, 0)),
                pl.BlockSpec((block_k, d_pad), lambda qi, ki: (ki, 0)),
            ],
            out_specs=pl.BlockSpec((block_q, d_pad), lambda qi, ki: (qi, 0)),
            scratch_shapes=[
                pltpu.VMEM((block_q, d_pad), jnp.bfloat16),  # scaled Q (hoisted)
                pltpu.VMEM((block_q, 1), jnp.float32),       # m (running max)
                pltpu.VMEM((block_q, 1), jnp.float32),       # l (only if no ones-column)
                pltpu.VMEM((block_q, d_pad), jnp.float32),   # acc
            ],
        ),
        compiler_params=pltpu.CompilerParams(
            dimension_semantics=("parallel", "arbitrary"),
            vmem_limit_bytes=48 * 1024 * 1024,
        ),
        cost_estimate=cost,
    )(q_p, k_p, v_p)

    return out_p[:seq_len, :d_k]


def _reference(q, k, v):
    d_k = q.shape[-1]
    scores = (q @ k.T) / jnp.sqrt(jnp.float32(d_k))
    w = jax.nn.softmax(scores, axis=-1)
    return w @ v


if __name__ == "__main__":
    key = jax.random.PRNGKey(0)
    kq, kk, kv_ = jax.random.split(key, 3)

    # Test 1: small shape matching the module's convention (seq=8, d_k=32).
    S, D = 8, 32
    q = jax.random.normal(kq, (S, D), dtype=jnp.float32)
    k = jax.random.normal(kk, (S, D), dtype=jnp.float32)
    v = jax.random.normal(kv_, (S, D), dtype=jnp.float32)
    out = jax.block_until_ready(scaled_dot_product_attention(q, k, v))
    ref = _reference(q, k, v)
    assert out.shape == (S, D)
    assert jnp.allclose(out, ref, atol=3e-2, rtol=3e-2), "mismatch (test 1)"

    # Test 2: seq_len not a tile multiple — multi-tile grid, online softmax
    # across KV tiles, padding and masking.
    S2, D2 = 136, 32
    q2 = jax.random.normal(kq, (S2, D2), dtype=jnp.float32)
    k2 = jax.random.normal(kk, (S2, D2), dtype=jnp.float32)
    v2 = jax.random.normal(kv_, (S2, D2), dtype=jnp.float32)
    out2 = jax.block_until_ready(
        scaled_dot_product_attention(q2, k2, v2, block_q=64, block_k=64))
    ref2 = _reference(q2, k2, v2)
    assert out2.shape == (S2, D2)
    assert jnp.allclose(out2, ref2, atol=3e-2, rtol=3e-2), "mismatch (test 2)"

    # Test 3: default tile selection (num_q = 2 for megacore, single KV tile).
    S3, D3 = 512, 64
    q3 = jax.random.normal(kq, (S3, D3), dtype=jnp.float32)
    k3 = jax.random.normal(kk, (S3, D3), dtype=jnp.float32)
    v3 = jax.random.normal(kv_, (S3, D3), dtype=jnp.float32)
    out3 = jax.block_until_ready(scaled_dot_product_attention(q3, k3, v3))
    ref3 = _reference(q3, k3, v3)
    assert out3.shape == (S3, D3)
    assert jnp.allclose(out3, ref3, atol=3e-2, rtol=3e-2), "mismatch (test 3)"

    print("KERNEL_OK")
</pallas_src>

<mosaic_0001>
module attributes {stable_mosaic.version = 11 : i64} {
  func.func @_flash_sdpa_kernel(%arg0: i32, %arg1: i32, %arg2: memref<16x128xbf16, #tpu.memory_space<vmem>>, %arg3: memref<16x128xbf16, #tpu.memory_space<vmem>>, %arg4: memref<16x128xbf16, #tpu.memory_space<vmem>>, %arg5: memref<16x128xf32, #tpu.memory_space<vmem>>, %arg6: memref<16x128xbf16, #tpu.memory_space<vmem>>, %arg7: memref<16x1xf32, #tpu.memory_space<vmem>>, %arg8: memref<16x1xf32, #tpu.memory_space<vmem>>, %arg9: memref<16x128xf32, #tpu.memory_space<vmem>>) attributes {dimension_semantics = [#tpu.dimension_semantics<parallel>, #tpu.dimension_semantics<arbitrary>], iteration_bounds = array<i64: 1, 1>, scalar_prefetch = 0 : i64, scratch_operands = 4 : i64, tpu.core_type = #tpu.core_type<tc>, window_params = [{transform_indices = @transform_0, window_bounds = array<i64: 16, 128>}, {transform_indices = @transform_1, window_bounds = array<i64: 16, 128>}, {transform_indices = @transform_2, window_bounds = array<i64: 16, 128>}, {transform_indices = @transform_3, window_bounds = array<i64: 16, 128>}]} {
    %c0_i32 = arith.constant 0 : i32
    %0 = arith.cmpi eq, %arg1, %c0_i32 : i32
    %1 = arith.extui %0 : i1 to i32
    %c0_i32_0 = arith.constant 0 : i32
    %2 = arith.cmpi ne, %1, %c0_i32_0 : i32
    scf.if %2 {
      %c0_19 = arith.constant 0 : index
      %c0_20 = arith.constant 0 : index
      %37 = vector.load %arg2[%c0_19, %c0_20] : memref<16x128xbf16, #tpu.memory_space<vmem>>, vector<16x128xbf16>
      %38 = arith.extf %37 : vector<16x128xbf16> to vector<16x128xf32>
      %cst_21 = arith.constant 0.255034864 : f32
      %39 = vector.broadcast %cst_21 : f32 to vector<16x128xf32>
      %40 = arith.mulf %38, %39 : vector<16x128xf32>
      %41 = arith.truncf %40 : vector<16x128xf32> to vector<16x128xbf16>
      %c0_22 = arith.constant 0 : index
      %c0_23 = arith.constant 0 : index
      %42 = vector.load %arg6[%c0_22, %c0_23] : memref<16x128xbf16, #tpu.memory_space<vmem>>, vector<16x128xbf16>
      tpu.vector_store %arg6[%c0_22, %c0_23], %41 {strides = array<i32>} : memref<16x128xbf16, #tpu.memory_space<vmem>>, vector<16x128xbf16>,
      %cst_24 = arith.constant -1.000000e+30 : f32
      %43 = vector.broadcast %cst_24 : f32 to vector<16x1xf32>
      %c0_25 = arith.constant 0 : index
      %c0_26 = arith.constant 0 : index
      %44 = vector.load %arg7[%c0_25, %c0_26] : memref<16x1xf32, #tpu.memory_space<vmem>>, vector<16x1xf32>
      tpu.vector_store %arg7[%c0_25, %c0_26], %43 {strides = array<i32>} : memref<16x1xf32, #tpu.memory_space<vmem>>, vector<16x1xf32>,
      %cst_27 = arith.constant 0.000000e+00 : f32
      %45 = vector.broadcast %cst_27 : f32 to vector<16x128xf32>
      %c0_28 = arith.constant 0 : index
      %c0_29 = arith.constant 0 : index
      %46 = vector.load %arg9[%c0_28, %c0_29] : memref<16x128xf32, #tpu.memory_space<vmem>>, vector<16x128xf32>
      tpu.vector_store %arg9[%c0_28, %c0_29], %45 {strides = array<i32>} : memref<16x128xf32, #tpu.memory_space<vmem>>, vector<16x128xf32>,
    } else {
    }
    %c0 = arith.constant 0 : index
    %c0_1 = arith.constant 0 : index
    %3 = vector.load %arg6[%c0, %c0_1] : memref<16x128xbf16, #tpu.memory_space<vmem>>, vector<16x128xbf16>
    %c0_2 = arith.constant 0 : index
    %c0_3 = arith.constant 0 : index
    %4 = vector.load %arg3[%c0_2, %c0_3] : memref<16x128xbf16, #tpu.memory_space<vmem>>, vector<16x128xbf16>
    %cst = arith.constant dense<0.000000e+00> : vector<16x16xf32>
    %5 = tpu.matmul %3, %4, %cst {dimension_numbers = #tpu.dot_dimension_numbers<[1], [1], [0], [0], [0, 0, 1, 0], [], []>} : vector<16x128xbf16>, vector<16x128xbf16>, vector<16x16xf32> -> vector<16x16xf32>
    %c16_i32 = arith.constant 16 : i32
    %6 = arith.muli %arg1, %c16_i32 : i32
    %7 = tpu.iota {dimensions = array<i32: 1>} : vector<1x16xi32>
    %8 = vector.broadcast %6 : i32 to vector<1x16xi32>
    %9 = arith.addi %8, %7 : vector<1x16xi32>
    %c8_i32 = arith.constant 8 : i32
    %10 = vector.broadcast %c8_i32 : i32 to vector<1x16xi32>
    %11 = arith.cmpi slt, %9, %10 : vector<1x16xi32>
    %cst_4 = arith.constant -1.000000e+30 : f32
    %12 = vector.shape_cast %11 : vector<1x16xi1> to vector<1x16xi1>
    %13 = vector.broadcast %12 : vector<1x16xi1> to vector<16x16xi1>
    %14 = vector.broadcast %cst_4 : f32 to vector<16x16xf32>
    %15 = arith.select %13, %5, %14 : vector<16x16xi1>, vector<16x16xf32>
    %c0_5 = arith.constant 0 : index
    %c0_6 = arith.constant 0 : index
    %16 = vector.load %arg7[%c0_5, %c0_6] : memref<16x1xf32, #tpu.memory_space<vmem>>, vector<16x1xf32>
    %cst_7 = arith.constant dense<0xFF800000> : vector<16xf32>
    %17 = vector.multi_reduction <maximumf>, %15, %cst_7 [1] : vector<16x16xf32> to vector<16xf32>
    %18 = vector.shape_cast %17 : vector<16xf32> to vector<16x1xf32>
    %19 = arith.maximumf %16, %18 : vector<16x1xf32>
    %20 = arith.subf %16, %19 : vector<16x1xf32>
    %21 = math.exp2 %20 : vector<16x1xf32>
    %22 = vector.broadcast %19 : vector<16x1xf32> to vector<16x16xf32>
    %23 = arith.subf %15, %22 : vector<16x16xf32>
    %24 = math.exp2 %23 : vector<16x16xf32>
    %25 = arith.truncf %24 : vector<16x16xf32> to vector<16x16xbf16>
    %c0_8 = arith.constant 0 : index
    %c0_9 = arith.constant 0 : index
    %26 = vector.load %arg9[%c0_8, %c0_9] : memref<16x128xf32, #tpu.memory_space<vmem>>, vector<16x128xf32>
    %27 = vector.broadcast %21 : vector<16x1xf32> to vector<16x128xf32>
    %28 = arith.mulf %27, %26 : vector<16x128xf32>
    %c0_10 = arith.constant 0 : index
    %c0_11 = arith.constant 0 : index
    %29 = vector.load %arg4[%c0_10, %c0_11] : memref<16x128xbf16, #tpu.memory_space<vmem>>, vector<16x128xbf16>
    %cst_12 = arith.constant dense<0.000000e+00> : vector<16x128xf32>
    %30 = tpu.matmul %25, %29, %cst_12 {dimension_numbers = #tpu.dot_dimension_numbers<[1], [0], [0], [1], [0, 0, 1, 1], [], []>} : vector<16x16xbf16>, vector<16x128xbf16>, vector<16x128xf32> -> vector<16x128xf32>
    %31 = arith.addf %28, %30 : vector<16x128xf32>
    %c0_13 = arith.constant 0 : index
    %c0_14 = arith.constant 0 : index
    %32 = vector.load %arg9[%c0_13, %c0_14] : memref<16x128xf32, #tpu.memory_space<vmem>>, vector<16x128xf32>
    tpu.vector_store %arg9[%c0_13, %c0_14], %31 {strides = array<i32>} : memref<16x128xf32, #tpu.memory_space<vmem>>, vector<16x128xf32>,
    %c0_15 = arith.constant 0 : index
    %c0_16 = arith.constant 0 : index
    %33 = vector.load %arg7[%c0_15, %c0_16] : memref<16x1xf32, #tpu.memory_space<vmem>>, vector<16x1xf32>
    tpu.vector_store %arg7[%c0_15, %c0_16], %19 {strides = array<i32>} : memref<16x1xf32, #tpu.memory_space<vmem>>, vector<16x1xf32>,
    %c0_i32_17 = arith.constant 0 : i32
    %34 = arith.cmpi eq, %arg1, %c0_i32_17 : i32
    %35 = arith.extui %34 : i1 to i32
    %c0_i32_18 = arith.constant 0 : i32
    %36 = arith.cmpi ne, %35, %c0_i32_18 : i32
    scf.if %36 {
      %c0_19 = arith.constant 0 : index
      %c0_20 = arith.constant 0 : index
      %37 = vector.load %arg9[%c0_19, %c0_20] : memref<16x128xf32, #tpu.memory_space<vmem>>, vector<16x128xf32>
      %38 = vector.extract_strided_slice %37 {offsets = [0, 127], sizes = [16, 1], strides = [1, 1]} : vector<16x128xf32> to vector<16x1xf32>
      %cst_21 = arith.constant 1.000000e+00 : f32
      %39 = vector.broadcast %cst_21 : f32 to vector<16x1xf32>
      %40 = arith.divf %39, %38 : vector<16x1xf32>
      %41 = vector.broadcast %40 : vector<16x1xf32> to vector<16x128xf32>
      %42 = arith.mulf %37, %41 : vector<16x128xf32>
      %c0_22 = arith.constant 0 : index
      %c0_23 = arith.constant 0 : index
      %43 = vector.load %arg5[%c0_22, %c0_23] : memref<16x128xf32, #tpu.memory_space<vmem>>, vector<16x128xf32>
      tpu.vector_store %arg5[%c0_22, %c0_23], %42 {strides = array<i32>} : memref<16x128xf32, #tpu.memory_space<vmem>>, vector<16x128xf32>,
    } else {
    }
    return
  }
  func.func @transform_0(%arg0: i32, %arg1: i32) -> (i32, i32) {
    %c0_i32 = arith.constant 0 : i32
    %c0_i32_0 = arith.constant 0 : i32
    return %arg0, %c0_i32 : i32, i32
  }
  func.func @transform_1(%arg0: i32, %arg1: i32) -> (i32, i32) {
    %c0_i32 = arith.constant 0 : i32
    %c0_i32_0 = arith.constant 0 : i32
    return %arg1, %c0_i32 : i32, i32
  }
  func.func @transform_2(%arg0: i32, %arg1: i32) -> (i32, i32) {
    %c0_i32 = arith.constant 0 : i32
    %c0_i32_0 = arith.constant 0 : i32
    return %arg1, %c0_i32 : i32, i32
  }
  func.func @transform_3(%arg0: i32, %arg1: i32) -> (i32, i32) {
    %c0_i32 = arith.constant 0 : i32
    %c0_i32_0 = arith.constant 0 : i32
    return %arg0, %c0_i32 : i32, i32
  }
}

</mosaic_0001>

<bundles_post_ra>
// kernel: tpu_custom_call.1
= control target key start
LH: loop header
LB: loop body
LE: loop exit
PB: predicated region body
PF: predicated region fallthrough
CT: control target
= control target key end

     0   :  { %8 = vsyncpa [#allocation7], 0  ;;  %s496_s0 = inlined_call_operand.hbm [shape: bf16[16,128], index: 0, kind: input, shape index: {}]   ;;  %s497_s1 = inlined_call_operand.hbm [shape: bf16[16,128], index: 1, kind: input, shape index: {}]   ;;  %s498_s2 = inlined_call_operand.hbm [shape: bf16[16,128], index: 2, kind: input, shape index: {}]   ;;  %s499_s3 = inlined_call_operand.hbm [shape: f32[16,128], index: 3, kind: output, shape index: {}]  }
   0x1   :  { %9 = vsyncpa [#allocation10], 0 }
   0x2   :  { %10 = vsyncpa [#allocation8], 0  ;;  %s444_s12 = smov [#allocation9]   ;;  %s445_s14 = smov [#allocation6]  }
   0x3   :  { %s28_s13 = sshll.u32 %s444_s12, 4  ;;  %s16_s15 = sshll.u32 %s445_s14, 4  ;;  %s29_s13 = int_to_ptr.vmem [resolvable:$true] %s28_s13  ;;  %s17_s15 = int_to_ptr.vmem [resolvable:$true] %s16_s15 }
   0x4   :  { %s366_s16 = scalar_lea.vmem %s29_s13, 128  ;;  %p371_p1 = scmp.lt.s32.totalorder %s29_s13, %s29_s13 }
   0x5   :  { %p367_p0 = scmp.ne.s32.totalorder %s29_s13, %s366_s16  ;;  %p372_p2 = scmp.lt.s32.totalorder %s366_s16, %s366_s16 }
   0x7   :  { %p373_p3 = por %p372_p2, %p371_p1 }
   0x9   :  { %p374_p4 = pnand %p373_p3, %p367_p0 }
   0xb   :  { %377 = shalt.err (!%p374_p4)
}
   0xc   :  { %s446_s17 = smov 64   ;;  %s447_s18 = smov 4  }
   0xd   :  { %34 = dma.hbm_to_vmem [thread:$0]  %s497_s1, 128, %s29_s13, [#allocation10], %s446_s17, %s446_s17, %s447_s18  }
   0xe   :  { %s386_s21 = scalar_lea.vmem %s17_s15, 128  ;;  %p391_p6 = scmp.lt.s32.totalorder %s17_s15, %s17_s15 }
   0xf   :  { %p387_p5 = scmp.ne.s32.totalorder %s17_s15, %s386_s21  ;;  %p392_p7 = scmp.lt.s32.totalorder %s386_s21, %s386_s21 }
  0x11   :  { %p393_p8 = por %p392_p7, %p391_p6 }
  0x13   :  { %p394_p9 = pnand %p393_p8, %p387_p5 }
  0x15   :  { %397 = shalt.err (!%p394_p9)
}
  0x16   :  { %22 = dma.hbm_to_vmem [thread:$0]  %s496_s0, 128, %s17_s15, [#allocation7], %s446_s17, %s446_s17, %s447_s18  }
  0x17   :  { %s448_s24 = smov [#allocation11]  }
  0x18   :  { %s40_s25 = sshll.u32 %s448_s24, 4  ;;  %s41_s25 = int_to_ptr.vmem [resolvable:$true] %s40_s25 }
  0x19   :  { %s406_s26 = scalar_lea.vmem %s41_s25, 128  ;;  %p411_p11 = scmp.lt.s32.totalorder %s41_s25, %s41_s25 }
  0x1a   :  { %p407_p10 = scmp.ne.s32.totalorder %s41_s25, %s406_s26  ;;  %p412_p12 = scmp.lt.s32.totalorder %s406_s26, %s406_s26 }
  0x1c   :  { %p413_p13 = por %p412_p12, %p411_p11 }
  0x1e   :  { %p414_p0 = pnand %p413_p13, %p407_p10 }
  0x20   :  { %417 = shalt.err (!%p414_p0)
}
  0x21   :  { %46 = dma.hbm_to_vmem [thread:$0]  %s498_s2, 128, %s41_s25, [#allocation10], %s446_s17, %s446_s17, %s447_s18  }
  0x22   :  { %438 = dma.done.wait [#allocation7], 128  }
  0x23   :  { %439 = vsyncadd [#allocation7], 4294967168 }
  0x24   :  { %440 = dma.done.wait [#allocation10], 256  }
  0x25   :  { %441 = vsyncadd [#allocation10], 4294967040  ;;  %v449_v0 = vmov 0.0   ;;  %vm450_vm0 = vmmov 0   ;;  %v343_v1 = vld [vmem:[#allocation9] sm:$0xff]   ;;  %v302_v2 = vld [vmem:[#allocation6] sm:$0xff]   ;;  %v140_v10 = vlaneseq }
  0x26   :  { %314 = vmatprep.subr.bf16.mxu0 %v449_v0  ;;  %316 = vmatprep.mubr.msk.bf16.mxu0 %vm450_vm0, %v449_v0  ;;  %v303_v3 = vunpack.c.l.bf16 %v302_v2  ;;  %v304_v4 = vunpack.c.h.bf16 %v302_v2  ;;  %vm77_vm1 = vcmask 7168   ;;  %v451_v9 = vmov -1e+30   ;;  %v345_v29 = vld [vmem:[#allocation11] sm:$0xff]   ;;  %s454_s0 = smov [#allocation12]  }
  0x27   :  { %320 = vmatprep.subr.bf16.mxu1 %v449_v0  ;;  %322 = vmatprep.mubr.msk.bf16.mxu1 %vm450_vm0, %v449_v0  ;;  %78 = vst.msk [vmem:[#allocation3] sm:$0xff] %vm77_vm1, %v451_v9  ;;  %79 = vst.msk [vmem:[#allocation3 + $0x8] sm:$0xff] %vm77_vm1, %v451_v9  ;;  %v141_v11 = vand.u32 127, %v140_v10  ;;  %vm151_vm3 = vcmask 130048   ;;  %v452_v20 = vmov 0   ;;  %v453_v39 = vmov 127  }
  0x28   :  { %315 = vmatpush3.bf16.xpose.msra.mxu0 %v343_v1  ;;  %v65_v5 = vmul.f32 0.25503486, %v303_v3  ;;  %v66_v6 = vmul.f32 0.25503486, %v304_v4  ;;  %339 = vset.pattern.permute.xlu1 %v452_v20  ;;  %s280_s2 = sshll.u32 %s454_s0, 4  ;;  %s281_s2 = int_to_ptr.vmem [resolvable:$true] %s280_s2 }
  0x29   :  { %vm144_vm2 = vcmp.lt.s32.totalorder %v141_v11, 8  ;;  %340 = vset.pattern.permute.xlu0 %v452_v20  ;;  %321 = vmatpush3.bf16.msra.mxu1 %v345_v29  ;;  %s418_s28 = scalar_lea.vmem %s281_s2, 256  ;;  %p423_p2 = scmp.lt.s32.totalorder %s281_s2, %s281_s2 }
  0x2a   :  { %v308_v7 = vpack.c.bf16 %v66_v6, %v65_v5  ;;  %p419_p1 = scmp.ne.s32.totalorder %s281_s2, %s418_s28  ;;  %p424_p3 = scmp.lt.s32.totalorder %s418_s28, %s418_s28 }
  0x2c   :  { %309 = vst [vmem:[#allocation2] sm:$0xff] %v308_v7   ;;  %p425_p4 = por %p424_p3, %p423_p2 }
  0x2e   :  { %v149_v21 = vld [vmem:[#allocation3] sm:$0xff]  ;;  %v150_v24 = vld [vmem:[#allocation3 + $0x8] sm:$0xff]  ;;  %p426_p5 = pnand %p425_p4, %p419_p1 }
  0x33   :  { %v344_v8 = vld [vmem:[#allocation2] sm:$0xff]  }
  0x34   :  { %317 = vmatmul.mubr.bf16.vlgmr.msra.gmra.mxu0 %v344_v8 }
  0xf4   :  { %v132_v12 = vpop.f32.mrf.mxu0 }
  0xf5   :  { %v147_v13 = vsel %vm144_vm2, %v132_v12, -1e+30 }
  0xf6   :  { %v318_v14 = vpop.f32.mrf.mxu0  ;;  %v152_v15 = vsel %vm151_vm3, %v147_v13, -inf }
  0xf7   :  { %153 = vmax.xlane.f32.xlu0 %v152_v15 }
  0xf8   :  { %v135_v16 = vpop.f32.mrf.mxu0 }
  0xf9   :  { %v148_v17 = vsel %vm144_vm2, %v135_v16, -1e+30 }
  0xfa   :  { %v319_v18 = vpop.f32.mrf.mxu0  ;;  %v155_v19 = vsel %vm151_vm3, %v148_v17, -inf }
  0xfb   :  { %156 = vmax.xlane.f32.xlu0 %v155_v19 }
 0x180   :  { %v154_v22 = vpop.xlane.xlu0 %153 }
 0x181   :  { %v158_v23 = vmax.f32 %v149_v21, %v154_v22 }
 0x183   :  { %v160_v25 = vsub.f32 %v149_v21, %v158_v23  ;;  %250 = vst.msk [vmem:[#allocation3] sm:$0xff] %vm77_vm1, %v158_v23  ;;  %166 = vperm.xlu1 %339, %v158_v23  }
 0x184   :  { %v157_v26 = vpop.xlane.xlu0 %156 }
 0x185   :  { %346 = vpow2.f32 %v160_v25  ;;  %v159_v27 = vmax.f32 %v150_v24, %v157_v26 }
 0x187   :  { %v161_v28 = vsub.f32 %v150_v24, %v159_v27  ;;  %251 = vst.msk [vmem:[#allocation3 + $0x8] sm:$0xff] %vm77_vm1, %v159_v27  ;;  %171 = vperm.xlu1 %339, %v159_v27  }
 0x189   :  { %348 = vpow2.f32 %v161_v28 }
 0x192   :  { %v347_v30 = vpop.eup %346 }
 0x193   :  { %183 = vperm.xlu0 %340, %v347_v30  }
 0x196   :  { %v349_v31 = vpop.eup %348 }
 0x197   :  { %188 = vperm.xlu1 %339, %v349_v31   ;;  %342 = vset.pattern.permute.xlu0 %v453_v39 }
 0x19b   :  { %341 = vset.pattern.permute.xlu1 %v453_v39 }
 0x1fe   :  { %v167_v32 = vpop.permute.xlu1 %166 }
 0x1ff   :  { %v174_v33 = vsub.f32 %v147_v13, %v167_v32 }
 0x201   :  { %350 = vpow2.f32 %v174_v33 }
 0x202   :  { %v172_v34 = vpop.permute.xlu1 %171 }
 0x203   :  { %v175_v35 = vsub.f32 %v148_v17, %v172_v34 }
 0x205   :  { %352 = vpow2.f32 %v175_v35 }
 0x20e   :  { %v351_v36 = vpop.eup %350  ;;  %v184_v40 = vpop.permute.xlu0 %183 }
 0x20f   :  { %v191_v41 = vmul.f32 0.0, %v184_v40 }
 0x212   :  { %v353_v37 = vpop.eup %352  ;;  %v189_v42 = vpop.permute.xlu1 %188 }
 0x213   :  { %v178_v38 = vpack.c.bf16 %v353_v37, %v351_v36  ;;  %v192_v46 = vmul.f32 0.0, %v189_v42 }
 0x215   :  { %323 = vmatmul.mubr.msk.bf16.vlgmr.msra.gmra.mxu1 %vm151_vm3, %v178_v38 }
 0x2d5   :  { %v238_v43 = vpop.f32.mrf.mxu1 }
 0x2d6   :  { %v245_v44 = vadd.f32 %v238_v43, %v191_v41 }
 0x2d7   :  { %v324_v45 = vpop.f32.mrf.mxu1 }
 0x2d8   :  { %354 = vrcp.f32 %v245_v44 }
 0x2d9   :  { %v241_v47 = vpop.f32.mrf.mxu1 }
 0x2da   :  { %v246_v48 = vadd.f32 %v241_v47, %v192_v46 }
 0x2db   :  { %v325_v49 = vpop.f32.mrf.mxu1 }
 0x2dc   :  { %356 = vrcp.f32 %v246_v48 }
 0x2e5   :  { %v355_v50 = vpop.eup %354 }
 0x2e6   :  { %263 = vperm.xlu1 %341, %v355_v50  }
 0x2e9   :  { %v357_v51 = vpop.eup %356 }
 0x2ea   :  { %268 = vperm.xlu1 %341, %v357_v51  }
 0x361   :  { %v264_v52 = vpop.permute.xlu1 %263 }
 0x362   :  { %v271_v53 = vmul.f32 %v264_v52, %v245_v44 }
 0x364   :  { %273 = vst [vmem:[#allocation12] sm:$0xff] %v271_v53 }
 0x365   :  { %v269_v54 = vpop.permute.xlu1 %268 }
 0x366   :  { %v272_v55 = vmul.f32 %v269_v54, %v246_v48 }
 0x368   :  { %274 = vst [vmem:[#allocation12 + $0x8] sm:$0xff] %v272_v55 }
 0x369   :  { %429 = shalt.err (!%p426_p5)
}
 0x36a   :  { %s455_s29 = smov 128   ;;  %s456_s30 = smov 8  }
 0x36b   :  { %286 = dma.vmem_to_hbm [thread:$0]  %s281_s2, 256, %s499_s3, [#allocation8], %s455_s29, %s455_s29, %s456_s30  }
 0x36c   :  { %442 = dma.done.wait [#allocation8], 256  }
 0x36d   :  { %443 = vsyncadd [#allocation8], 4294967040 }
 0x36e   :  { %290 = vsyncpa [#allocation7], 1 }
 0x36f   :  { %291 = vsyncpa [#allocation10], 1 }
 0x370   :  { %292 = vsyncpa [#allocation8], 1 }

</bundles_post_ra>
